<compile_context>
chip_gen: v6e
topology: v6e:2x2x1
jax: 0.10.0
libtpu: 0.0.40
codegen_flags: <defaults>
</compile_context>

<pallas_src>
import jax
import jax.numpy as jnp
from jax.experimental import pallas as pl
from jax.experimental.pallas import tpu as pltpu

_LANE = 128


def _mlp_kernel(x_ref,
                w1_ref, b1_ref,
                w2_ref, b2_ref,
                w3_ref, b3_ref,
                w4_ref, b4_ref,
                w5_ref, b5_ref,
                o_ref):
    # Matmuls hit the MXU (f32 accumulation); bias add + ReLU stay in f32 on
    # the VPU.  Everything for one batch tile stays resident in VMEM.
    cdt = w1_ref.dtype                       # compute dtype (f32 or bf16)
    x = x_ref[...].astype(cdt)

    h = jnp.dot(x, w1_ref[...], preferred_element_type=jnp.float32) + b1_ref[...]
    h = jnp.maximum(h, 0.0)

    h = jnp.dot(h.astype(cdt), w2_ref[...], preferred_element_type=jnp.float32) + b2_ref[...]
    h = jnp.maximum(h, 0.0)

    h = jnp.dot(h.astype(cdt), w3_ref[...], preferred_element_type=jnp.float32) + b3_ref[...]
    h = jnp.maximum(h, 0.0)

    h = jnp.dot(h.astype(cdt), w4_ref[...], preferred_element_type=jnp.float32) + b4_ref[...]
    h = jnp.maximum(h, 0.0)

    out = jnp.dot(h.astype(cdt), w5_ref[...], preferred_element_type=jnp.float32) + b5_ref[...]
    o_ref[...] = out.astype(o_ref.dtype)


def _round_up(n, m):
    return ((n + m - 1) // m) * m


def _pad_to(a, shape):
    pads = [(0, s - d) for d, s in zip(a.shape, shape)]
    if all(p == (0, 0) for p in pads):
        return a
    return jnp.pad(a, pads)


def _choose_bm(B):
    """Pick a batch tile: <=256 rows (multiple of 8), and >=2 tiles when
    cheaply possible so the grid pipelines / shards across v7x's two TCs."""
    cap = 256
    if B > cap:
        return cap
    if B >= 16 and B % 16 == 0:
        return B // 2            # multiple of 8, two parallel tiles
    return B                     # full-array block (always a legal block shape)


def space_invaders_mlp(x, params, *, batch_tile=None, compute_dtype=jnp.float32):
    """Forward pass.  x: (B, ...) flattened to (B, state_dim).  Returns (B, n_actions) f32."""
    B = x.shape[0]
    x = x.reshape(B, -1).astype(jnp.float32)      # == x.view(x.size(0), -1)
    state_dim = x.shape[1]

    (w1, b1), (w2, b2), (w3, b3), (w4, b4), (w5, b5) = params
    n_actions = w5.shape[1]

    # --- lane-dense padding of the last two layers (bit-exact: ReLU(0)=0,
    #     zero weight rows/cols contribute nothing, extra cols sliced away) ---
    h4 = _round_up(w4.shape[1], _LANE)            # 64  -> 128
    n_pad = _round_up(n_actions, _LANE)           # 6   -> 128
    w4p = _pad_to(w4, (w4.shape[0], h4))
    b4p = _pad_to(b4, (1, h4))
    w5p = _pad_to(w5, (h4, n_pad))
    b5p = _pad_to(b5, (1, n_pad))

    # --- compute dtype (bf16 on v6e/v7x halves weight DMA + full MXU rate;
    #     accumulation stays f32) ---
    cdt = jnp.dtype(compute_dtype)
    ws = [w.astype(cdt) for w in (w1, w2, w3, w4p, w5p)]
    bs = [b.astype(jnp.float32) for b in (b1, b2, b3, b4p, b5p)]
    x = x.astype(cdt)

    # --- batch tiling (pad batch so any B is supported) ---
    bm = batch_tile or _choose_bm(B)
    B_pad = _round_up(B, bm)
    if B_pad != B:
        x = jnp.pad(x, ((0, B_pad - B), (0, 0)))
    grid = (B_pad // bm,)

    def w_spec(shape):
        # Constant block index: weights/biases stay resident in VMEM across
        # all grid steps (no re-fetch).
        return pl.BlockSpec(shape, lambda i: (0, 0))

    in_specs = [pl.BlockSpec((bm, state_dim), lambda i: (i, 0))]   # x tile
    for w, b in zip(ws, bs):
        in_specs.append(w_spec(w.shape))
        in_specs.append(w_spec(b.shape))
    out_specs = pl.BlockSpec((bm, n_pad), lambda i: (i, 0))

    # Advisory cost estimate: the kernel is tiny and overhead/DMA bound.
    dims = [state_dim, 128, 128, 128, h4, n_pad]
    flops = 2 * B_pad * sum(dims[i] * dims[i + 1] for i in range(5))
    weight_bytes = sum(int(w.size) * w.dtype.itemsize for w in ws)
    bias_bytes = sum(int(b.size) * b.dtype.itemsize for b in bs)
    bytes_accessed = (B_pad * state_dim * cdt.itemsize
                      + weight_bytes + bias_bytes
                      + B_pad * n_pad * 4)
    cost = pl.CostEstimate(flops=flops, transcendentals=0,
                           bytes_accessed=bytes_accessed)

    args = [x]
    for w, b in zip(ws, bs):
        args.append(w)
        args.append(b)

    out = pl.pallas_call(
        _mlp_kernel,
        out_shape=jax.ShapeDtypeStruct((B_pad, n_pad), jnp.float32),
        grid_spec=pltpu.PrefetchScalarGridSpec(
            num_scalar_prefetch=0,
            grid=grid,
            in_specs=in_specs,
            out_specs=out_specs,
        ),
        compiler_params=pltpu.CompilerParams(
            dimension_semantics=("parallel",)),
        cost_estimate=cost,
    )(*args)

    return out[:B, :n_actions]


def init_params(key, state_dim, n_actions):
    """Deterministic init mimicking nn.Linear default (uniform +/- 1/sqrt(fan_in)).

    Weights are stored transposed: (in_features, out_features).
    Biases are stored as (1, out_features).
    """
    dims = [state_dim, 128, 128, 128, 64, n_actions]
    params = []
    for i in range(5):
        fan_in, fan_out = dims[i], dims[i + 1]
        key, kw, kb = jax.random.split(key, 3)
        bound = 1.0 / jnp.sqrt(fan_in)
        w = jax.random.uniform(kw, (fan_in, fan_out), jnp.float32, -bound, bound)
        b = jax.random.uniform(kb, (1, fan_out), jnp.float32, -bound, bound)
        params.append((w, b))
    return params


def reference_mlp(x, params):
    """Plain-JAX f32 reference (semantically identical to the PyTorch forward)."""
    h = x.reshape(x.shape[0], -1)
    for li, (w, b) in enumerate(params):
        h = h @ w + b
        if li < len(params) - 1:
            h = jnp.maximum(h, 0.0)
    return h


if __name__ == "__main__":
    key = jax.random.PRNGKey(0)
    state_dim, n_actions = 128, 6   # Space Invaders RAM obs (128,) -> 6 actions
    k_x, k_p, k_x2 = jax.random.split(key, 3)
    params = init_params(k_p, state_dim, n_actions)

    # 1) Small batch, f32 compute: exact match vs reference.
    B = 8
    x = jax.random.normal(k_x, (B, state_dim), dtype=jnp.float32)
    out = jax.block_until_ready(space_invaders_mlp(x, params,
                                                   compute_dtype=jnp.float32))
    ref = reference_mlp(x, params)
    assert out.shape == (B, n_actions)
    assert jnp.allclose(out, ref, atol=1e-4, rtol=1e-4), "f32 mismatch vs reference"

    # 2) Larger batch (exercises multi-tile grid + batch padding), f32 compute.
    B2 = 32
    x2 = jax.random.normal(k_x2, (B2, state_dim), dtype=jnp.float32)
    out2 = jax.block_until_ready(space_invaders_mlp(x2, params,
                                                    compute_dtype=jnp.float32))
    ref2 = reference_mlp(x2, params)
    assert out2.shape == (B2, n_actions)
    assert jnp.allclose(out2, ref2, atol=1e-4, rtol=1e-4), "tiled f32 mismatch"

    # 3) bf16 compute path (full-rate MXU on v6e/v7x), f32 accumulation.
    out_bf16 = jax.block_until_ready(space_invaders_mlp(x, params,
                                                        compute_dtype=jnp.bfloat16))
    assert out_bf16.shape == (B, n_actions)
    assert jnp.allclose(out_bf16, ref, atol=5e-2, rtol=5e-2), "bf16 mismatch"

    print("KERNEL_OK")
</pallas_src>

<mosaic_0001>
module attributes {stable_mosaic.version = 11 : i64} {
  func.func @_mlp_kernel(%arg0: i32, %arg1: memref<8x128xf32, #tpu.memory_space<vmem>>, %arg2: memref<128x128xf32, #tpu.memory_space<vmem>>, %arg3: memref<1x128xf32, #tpu.memory_space<vmem>>, %arg4: memref<128x128xf32, #tpu.memory_space<vmem>>, %arg5: memref<1x128xf32, #tpu.memory_space<vmem>>, %arg6: memref<128x128xf32, #tpu.memory_space<vmem>>, %arg7: memref<1x128xf32, #tpu.memory_space<vmem>>, %arg8: memref<128x128xf32, #tpu.memory_space<vmem>>, %arg9: memref<1x128xf32, #tpu.memory_space<vmem>>, %arg10: memref<128x128xf32, #tpu.memory_space<vmem>>, %arg11: memref<1x128xf32, #tpu.memory_space<vmem>>, %arg12: memref<8x128xf32, #tpu.memory_space<vmem>>) attributes {dimension_semantics = [#tpu.dimension_semantics<parallel>], iteration_bounds = array<i64: 1>, scalar_prefetch = 0 : i64, scratch_operands = 0 : i64, tpu.core_type = #tpu.core_type<tc>, window_params = [{transform_indices = @transform_0, window_bounds = array<i64: 8, 128>}, {pipeline_mode = #tpu.pipeline_mode<synchronous>, transform_indices = @transform_1, window_bounds = array<i64: 128, 128>}, {pipeline_mode = #tpu.pipeline_mode<synchronous>, transform_indices = @transform_2, window_bounds = array<i64: 1, 128>}, {pipeline_mode = #tpu.pipeline_mode<synchronous>, transform_indices = @transform_3, window_bounds = array<i64: 128, 128>}, {pipeline_mode = #tpu.pipeline_mode<synchronous>, transform_indices = @transform_4, window_bounds = array<i64: 1, 128>}, {pipeline_mode = #tpu.pipeline_mode<synchronous>, transform_indices = @transform_5, window_bounds = array<i64: 128, 128>}, {pipeline_mode = #tpu.pipeline_mode<synchronous>, transform_indices = @transform_6, window_bounds = array<i64: 1, 128>}, {pipeline_mode = #tpu.pipeline_mode<synchronous>, transform_indices = @transform_7, window_bounds = array<i64: 128, 128>}, {pipeline_mode = #tpu.pipeline_mode<synchronous>, transform_indices = @transform_8, window_bounds = array<i64: 1, 128>}, {pipeline_mode = #tpu.pipeline_mode<synchronous>, transform_indices = @transform_9, window_bounds = array<i64: 128, 128>}, {pipeline_mode = #tpu.pipeline_mode<synchronous>, transform_indices = @transform_10, window_bounds = array<i64: 1, 128>}, {transform_indices = @transform_11, window_bounds = array<i64: 8, 128>}]} {
    %c0 = arith.constant 0 : index
    %c0_0 = arith.constant 0 : index
    %0 = vector.load %arg1[%c0, %c0_0] : memref<8x128xf32, #tpu.memory_space<vmem>>, vector<8x128xf32>
    %c0_1 = arith.constant 0 : index
    %c0_2 = arith.constant 0 : index
    %1 = vector.load %arg2[%c0_1, %c0_2] : memref<128x128xf32, #tpu.memory_space<vmem>>, vector<128x128xf32>
    %cst = arith.constant dense<0.000000e+00> : vector<8x128xf32>
    %2 = tpu.matmul %0, %1, %cst {dimension_numbers = #tpu.dot_dimension_numbers<[1], [0], [0], [1], [0, 0, 1, 1], [], []>} : vector<8x128xf32>, vector<128x128xf32>, vector<8x128xf32> -> vector<8x128xf32>
    %c0_3 = arith.constant 0 : index
    %c0_4 = arith.constant 0 : index
    %3 = vector.load %arg3[%c0_3, %c0_4] : memref<1x128xf32, #tpu.memory_space<vmem>>, vector<1x128xf32>
    %4 = vector.broadcast %3 : vector<1x128xf32> to vector<8x128xf32>
    %5 = arith.addf %2, %4 : vector<8x128xf32>
    %cst_5 = arith.constant 0.000000e+00 : f32
    %6 = vector.broadcast %cst_5 : f32 to vector<8x128xf32>
    %7 = arith.maximumf %5, %6 : vector<8x128xf32>
    %c0_6 = arith.constant 0 : index
    %c0_7 = arith.constant 0 : index
    %8 = vector.load %arg4[%c0_6, %c0_7] : memref<128x128xf32, #tpu.memory_space<vmem>>, vector<128x128xf32>
    %cst_8 = arith.constant dense<0.000000e+00> : vector<8x128xf32>
    %9 = tpu.matmul %7, %8, %cst_8 {dimension_numbers = #tpu.dot_dimension_numbers<[1], [0], [0], [1], [0, 0, 1, 1], [], []>} : vector<8x128xf32>, vector<128x128xf32>, vector<8x128xf32> -> vector<8x128xf32>
    %c0_9 = arith.constant 0 : index
    %c0_10 = arith.constant 0 : index
    %10 = vector.load %arg5[%c0_9, %c0_10] : memref<1x128xf32, #tpu.memory_space<vmem>>, vector<1x128xf32>
    %11 = vector.broadcast %10 : vector<1x128xf32> to vector<8x128xf32>
    %12 = arith.addf %9, %11 : vector<8x128xf32>
    %cst_11 = arith.constant 0.000000e+00 : f32
    %13 = vector.broadcast %cst_11 : f32 to vector<8x128xf32>
    %14 = arith.maximumf %12, %13 : vector<8x128xf32>
    %c0_12 = arith.constant 0 : index
    %c0_13 = arith.constant 0 : index
    %15 = vector.load %arg6[%c0_12, %c0_13] : memref<128x128xf32, #tpu.memory_space<vmem>>, vector<128x128xf32>
    %cst_14 = arith.constant dense<0.000000e+00> : vector<8x128xf32>
    %16 = tpu.matmul %14, %15, %cst_14 {dimension_numbers = #tpu.dot_dimension_numbers<[1], [0], [0], [1], [0, 0, 1, 1], [], []>} : vector<8x128xf32>, vector<128x128xf32>, vector<8x128xf32> -> vector<8x128xf32>
    %c0_15 = arith.constant 0 : index
    %c0_16 = arith.constant 0 : index
    %17 = vector.load %arg7[%c0_15, %c0_16] : memref<1x128xf32, #tpu.memory_space<vmem>>, vector<1x128xf32>
    %18 = vector.broadcast %17 : vector<1x128xf32> to vector<8x128xf32>
    %19 = arith.addf %16, %18 : vector<8x128xf32>
    %cst_17 = arith.constant 0.000000e+00 : f32
    %20 = vector.broadcast %cst_17 : f32 to vector<8x128xf32>
    %21 = arith.maximumf %19, %20 : vector<8x128xf32>
    %c0_18 = arith.constant 0 : index
    %c0_19 = arith.constant 0 : index
    %22 = vector.load %arg8[%c0_18, %c0_19] : memref<128x128xf32, #tpu.memory_space<vmem>>, vector<128x128xf32>
    %cst_20 = arith.constant dense<0.000000e+00> : vector<8x128xf32>
    %23 = tpu.matmul %21, %22, %cst_20 {dimension_numbers = #tpu.dot_dimension_numbers<[1], [0], [0], [1], [0, 0, 1, 1], [], []>} : vector<8x128xf32>, vector<128x128xf32>, vector<8x128xf32> -> vector<8x128xf32>
    %c0_21 = arith.constant 0 : index
    %c0_22 = arith.constant 0 : index
    %24 = vector.load %arg9[%c0_21, %c0_22] : memref<1x128xf32, #tpu.memory_space<vmem>>, vector<1x128xf32>
    %25 = vector.broadcast %24 : vector<1x128xf32> to vector<8x128xf32>
    %26 = arith.addf %23, %25 : vector<8x128xf32>
    %cst_23 = arith.constant 0.000000e+00 : f32
    %27 = vector.broadcast %cst_23 : f32 to vector<8x128xf32>
    %28 = arith.maximumf %26, %27 : vector<8x128xf32>
    %c0_24 = arith.constant 0 : index
    %c0_25 = arith.constant 0 : index
    %29 = vector.load %arg10[%c0_24, %c0_25] : memref<128x128xf32, #tpu.memory_space<vmem>>, vector<128x128xf32>
    %cst_26 = arith.constant dense<0.000000e+00> : vector<8x128xf32>
    %30 = tpu.matmul %28, %29, %cst_26 {dimension_numbers = #tpu.dot_dimension_numbers<[1], [0], [0], [1], [0, 0, 1, 1], [], []>} : vector<8x128xf32>, vector<128x128xf32>, vector<8x128xf32> -> vector<8x128xf32>
    %c0_27 = arith.constant 0 : index
    %c0_28 = arith.constant 0 : index
    %31 = vector.load %arg11[%c0_27, %c0_28] : memref<1x128xf32, #tpu.memory_space<vmem>>, vector<1x128xf32>
    %32 = vector.broadcast %31 : vector<1x128xf32> to vector<8x128xf32>
    %33 = arith.addf %30, %32 : vector<8x128xf32>
    %c0_29 = arith.constant 0 : index
    %c0_30 = arith.constant 0 : index
    %34 = vector.load %arg12[%c0_29, %c0_30] : memref<8x128xf32, #tpu.memory_space<vmem>>, vector<8x128xf32>
    tpu.vector_store %arg12[%c0_29, %c0_30], %33 {strides = array<i32>} : memref<8x128xf32, #tpu.memory_space<vmem>>, vector<8x128xf32>,
    return
  }
  func.func @transform_0(%arg0: i32) -> (i32, i32) {
    %c0_i32 = arith.constant 0 : i32
    %c0_i32_0 = arith.constant 0 : i32
    return %arg0, %c0_i32 : i32, i32
  }
  func.func @transform_1(%arg0: i32) -> (i32, i32) {
    %c0_i32 = arith.constant 0 : i32
    %c0_i32_0 = arith.constant 0 : i32
    %c0_i32_1 = arith.constant 0 : i32
    return %c0_i32, %c0_i32_0 : i32, i32
  }
  func.func @transform_2(%arg0: i32) -> (i32, i32) {
    %c0_i32 = arith.constant 0 : i32
    %c0_i32_0 = arith.constant 0 : i32
    %c0_i32_1 = arith.constant 0 : i32
    return %c0_i32, %c0_i32_0 : i32, i32
  }
  func.func @transform_3(%arg0: i32) -> (i32, i32) {
    %c0_i32 = arith.constant 0 : i32
    %c0_i32_0 = arith.constant 0 : i32
    %c0_i32_1 = arith.constant 0 : i32
    return %c0_i32, %c0_i32_0 : i32, i32
  }
  func.func @transform_4(%arg0: i32) -> (i32, i32) {
    %c0_i32 = arith.constant 0 : i32
    %c0_i32_0 = arith.constant 0 : i32
    %c0_i32_1 = arith.constant 0 : i32
    return %c0_i32, %c0_i32_0 : i32, i32
  }
  func.func @transform_5(%arg0: i32) -> (i32, i32) {
    %c0_i32 = arith.constant 0 : i32
    %c0_i32_0 = arith.constant 0 : i32
    %c0_i32_1 = arith.constant 0 : i32
    return %c0_i32, %c0_i32_0 : i32, i32
  }
  func.func @transform_6(%arg0: i32) -> (i32, i32) {
    %c0_i32 = arith.constant 0 : i32
    %c0_i32_0 = arith.constant 0 : i32
    %c0_i32_1 = arith.constant 0 : i32
    return %c0_i32, %c0_i32_0 : i32, i32
  }
  func.func @transform_7(%arg0: i32) -> (i32, i32) {
    %c0_i32 = arith.constant 0 : i32
    %c0_i32_0 = arith.constant 0 : i32
    %c0_i32_1 = arith.constant 0 : i32
    return %c0_i32, %c0_i32_0 : i32, i32
  }
  func.func @transform_8(%arg0: i32) -> (i32, i32) {
    %c0_i32 = arith.constant 0 : i32
    %c0_i32_0 = arith.constant 0 : i32
    %c0_i32_1 = arith.constant 0 : i32
    return %c0_i32, %c0_i32_0 : i32, i32
  }
  func.func @transform_9(%arg0: i32) -> (i32, i32) {
    %c0_i32 = arith.constant 0 : i32
    %c0_i32_0 = arith.constant 0 : i32
    %c0_i32_1 = arith.constant 0 : i32
    return %c0_i32, %c0_i32_0 : i32, i32
  }
  func.func @transform_10(%arg0: i32) -> (i32, i32) {
    %c0_i32 = arith.constant 0 : i32
    %c0_i32_0 = arith.constant 0 : i32
    %c0_i32_1 = arith.constant 0 : i32
    return %c0_i32, %c0_i32_0 : i32, i32
  }
  func.func @transform_11(%arg0: i32) -> (i32, i32) {
    %c0_i32 = arith.constant 0 : i32
    %c0_i32_0 = arith.constant 0 : i32
    return %arg0, %c0_i32 : i32, i32
  }
}

</mosaic_0001>

<bundles_post_ra>
// kernel: tpu_custom_call.1
= control target key start
LH: loop header
LB: loop body
LE: loop exit
PB: predicated region body
PF: predicated region fallthrough
CT: control target
= control target key end

     0   :  { %16 = vsyncpa [#allocation3], 0  ;;  %s1246_s0 = inlined_call_operand.hbm [shape: f32[8,128], index: 0, kind: input, shape index: {}]   ;;  %s1247_s1 = inlined_call_operand.hbm [shape: f32[128,128], index: 1, kind: input, shape index: {}]   ;;  %s1248_s2 = inlined_call_operand.vmem [shape: f32[1,128], index: 2, kind: input, shape index: {}]   ;;  %s1249_s3 = inlined_call_operand.hbm [shape: f32[128,128], index: 3, kind: input, shape index: {}]   ;;  %s1250_s4 = inlined_call_operand.vmem [shape: f32[1,128], index: 4, kind: input, shape index: {}]   ;;  %s1251_s5 = inlined_call_operand.hbm [shape: f32[128,128], index: 5, kind: input, shape index: {}]   ;;  %s1252_s6 = inlined_call_operand.vmem [shape: f32[1,128], index: 6, kind: input, shape index: {}]   ;;  %s1253_s7 = inlined_call_operand.hbm [shape: f32[128,128], index: 7, kind: input, shape index: {}]   ;;  %s1254_s8 = inlined_call_operand.vmem [shape: f32[1,128], index: 8, kind: input, shape index: {}]   ;;  %s1255_s9 = inlined_call_operand.hbm [shape: f32[128,128], index: 9, kind: input, shape index: {}]   ;;  %s1256_s10 = inlined_call_operand.vmem [shape: f32[1,128], index: 10, kind: input, shape index: {}]   ;;  %s1257_s11 = inlined_call_operand.hbm [shape: f32[8,128], index: 11, kind: output, shape index: {}]  }
   0x1   :  { %17 = vsyncpa [#allocation6], 0 }
   0x2   :  { %18 = vsyncpa [#allocation9], 0 }
   0x3   :  { %19 = vsyncpa [#allocation12], 0 }
   0x4   :  { %20 = vsyncpa [#allocation4], 0  ;;  %s1034_s17 = smov [#allocation5]  }
   0x5   :  { %s36_s18 = sshll.u32 %s1034_s17, 4  ;;  %s37_s18 = int_to_ptr.vmem [resolvable:$true] %s36_s18 }
   0x6   :  { %s892_s19 = scalar_lea.vmem %s37_s18, 2048  ;;  %p897_p1 = scmp.lt.s32.totalorder %s37_s18, %s37_s18 }
   0x7   :  { %p893_p0 = scmp.ne.s32.totalorder %s37_s18, %s892_s19  ;;  %p898_p2 = scmp.lt.s32.totalorder %s892_s19, %s892_s19 }
   0x9   :  { %p899_p3 = por %p898_p2, %p897_p1 }
   0xb   :  { %p900_p4 = pnand %p899_p3, %p893_p0 }
   0xd   :  { %903 = shalt.err (!%p900_p4)
}
   0xe   :  { %s1035_s20 = smov 128   ;;  %s1036_s21 = smov 8  }
   0xf   :  { %42 = dma.hbm_to_vmem [thread:$0]  %s1247_s1, 2048, %s37_s18, [#allocation6], %s1035_s20, %s1035_s20, %s1036_s21  }
  0x10   :  { %s1037_s24 = smov [#allocation8]   ;;  %s1038_s26 = smov [#allocation2]  }
  0x11   :  { %s64_s25 = sshll.u32 %s1037_s24, 4  ;;  %s27_s27 = sshll.u32 %s1038_s26, 4  ;;  %s65_s25 = int_to_ptr.vmem [resolvable:$true] %s64_s25  ;;  %s28_s27 = int_to_ptr.vmem [resolvable:$true] %s27_s27 }
  0x12   :  { %s912_s28 = scalar_lea.vmem %s65_s25, 2048  ;;  %p917_p6 = scmp.lt.s32.totalorder %s65_s25, %s65_s25 }
  0x13   :  { %p913_p5 = scmp.ne.s32.totalorder %s65_s25, %s912_s28  ;;  %p918_p7 = scmp.lt.s32.totalorder %s912_s28, %s912_s28 }
  0x15   :  { %p919_p8 = por %p918_p7, %p917_p6 }
  0x17   :  { %p920_p9 = pnand %p919_p8, %p913_p5 }
  0x19   :  { %923 = shalt.err (!%p920_p9)
}
  0x1a   :  { %70 = dma.hbm_to_vmem [thread:$0]  %s1251_s5, 2048, %s65_s25, [#allocation9], %s1035_s20, %s1035_s20, %s1036_s21  }
  0x1b   :  { %s932_s1 = scalar_lea.vmem %s28_s27, 128  ;;  %p937_p11 = scmp.lt.s32.totalorder %s28_s27, %s28_s27 }
  0x1c   :  { %p933_p10 = scmp.ne.s32.totalorder %s28_s27, %s932_s1  ;;  %p938_p12 = scmp.lt.s32.totalorder %s932_s1, %s932_s1 }
  0x1e   :  { %p939_p13 = por %p938_p12, %p937_p11 }
  0x20   :  { %p940_p0 = pnand %p939_p13, %p933_p10 }
  0x22   :  { %943 = shalt.err (!%p940_p0)
}
  0x23   :  { %30 = dma.hbm_to_vmem [thread:$0]  %s1246_s0, 128, %s28_s27, [#allocation3]  }
  0x24   :  { %s1039_s14 = smov [#allocation7]   ;;  %s1040_s16 = smov [#allocation10]  }
  0x25   :  { %s50_s15 = sshll.u32 %s1039_s14, 4  ;;  %s78_s17 = sshll.u32 %s1040_s16, 4  ;;  %s51_s15 = int_to_ptr.vmem [resolvable:$true] %s50_s15  ;;  %s79_s17 = int_to_ptr.vmem [resolvable:$true] %s78_s17 }
  0x26   :  { %s952_s18 = scalar_lea.vmem %s51_s15, 2048  ;;  %p957_p2 = scmp.lt.s32.totalorder %s51_s15, %s51_s15 }
  0x27   :  { %p953_p1 = scmp.ne.s32.totalorder %s51_s15, %s952_s18  ;;  %p958_p3 = scmp.lt.s32.totalorder %s952_s18, %s952_s18 }
  0x29   :  { %p959_p4 = por %p958_p3, %p957_p2 }
  0x2b   :  { %p960_p5 = pnand %p959_p4, %p953_p1 }
  0x2d   :  { %963 = shalt.err (!%p960_p5)
}
  0x2e   :  { %56 = dma.hbm_to_vmem [thread:$0]  %s1249_s3, 2048, %s51_s15, [#allocation6], %s1035_s20, %s1035_s20, %s1036_s21  }
  0x2f   :  { %s972_s0 = scalar_lea.vmem %s79_s17, 2048  ;;  %p977_p7 = scmp.lt.s32.totalorder %s79_s17, %s79_s17 }
  0x30   :  { %p973_p6 = scmp.ne.s32.totalorder %s79_s17, %s972_s0  ;;  %p978_p8 = scmp.lt.s32.totalorder %s972_s0, %s972_s0 }
  0x32   :  { %p979_p9 = por %p978_p8, %p977_p7 }
  0x34   :  { %p980_p10 = pnand %p979_p9, %p973_p6 }
  0x36   :  { %983 = shalt.err (!%p980_p10)
}
  0x37   :  { %84 = dma.hbm_to_vmem [thread:$0]  %s1253_s7, 2048, %s79_s17, [#allocation9], %s1035_s20, %s1035_s20, %s1036_s21  }
  0x38   :  { %s1041_s24 = smov [#allocation11]  }
  0x39   :  { %s92_s25 = sshll.u32 %s1041_s24, 4  ;;  %s93_s25 = int_to_ptr.vmem [resolvable:$true] %s92_s25 }
  0x3a   :  { %s992_s26 = scalar_lea.vmem %s93_s25, 2048  ;;  %p997_p12 = scmp.lt.s32.totalorder %s93_s25, %s93_s25 }
  0x3b   :  { %p993_p11 = scmp.ne.s32.totalorder %s93_s25, %s992_s26  ;;  %p998_p13 = scmp.lt.s32.totalorder %s992_s26, %s992_s26 }
  0x3d   :  { %p999_p0 = por %p998_p13, %p997_p12 }
  0x3f   :  { %p1000_p1 = pnand %p999_p0, %p993_p11 }
  0x41   :  { %1003 = shalt.err (!%p1000_p1)
}
  0x42   :  { %98 = dma.hbm_to_vmem [thread:$0]  %s1255_s9, 2048, %s93_s25, [#allocation12], %s1035_s20, %s1035_s20, %s1036_s21  }
  0x43   :  { %1024 = dma.done.wait [#allocation3], 128  }
  0x44   :  { %1025 = vsyncadd [#allocation3], 4294967168 }
  0x45   :  { %1026 = dma.done.wait [#allocation6], 4096  }
  0x46   :  { %1027 = vsyncadd [#allocation6], 4294963200 }
  0x47   :  { %1028 = dma.done.wait [#allocation9], 4096  }
  0x48   :  { %1029 = vsyncadd [#allocation9], 4294963200 }
  0x49   :  { %1030 = dma.done.wait [#allocation12], 2048  }
  0x4a   :  { %1031 = vsyncadd [#allocation12], 4294965248  ;;  %v1042_v0 = vmov 0.0   ;;  %vm1043_vm0 = vmmov 0   ;;  %v135_v1 = vld [vmem:[#allocation5 + $0x78] sm:$0xff]  ;;  %v134_v2 = vld [vmem:[#allocation5 + $0x70] sm:$0xff] }
  0x4b   :  { %698 = vmatprep.subr.mxu0 %v1042_v0  ;;  %730 = vmatprep.mubr.msk.f32.mxu0 %vm1043_vm0, %v1042_v0  ;;  %v133_v3 = vld [vmem:[#allocation5 + $0x68] sm:$0xff]  ;;  %v132_v4 = vld [vmem:[#allocation5 + $0x60] sm:$0xff]  ;;  %v229_v5 = vld [vmem:[#allocation7 + $0x78] sm:$0xff]  ;;  %s1044_s1 = smov [#allocation13]  }
  0x4c   :  { %733 = vmatprep.subr.mxu1 %v1042_v0  ;;  %765 = vmatprep.mubr.msk.f32.mxu1 %vm1043_vm0, %v1042_v0  ;;  %v131_v6 = vld [vmem:[#allocation5 + $0x58] sm:$0xff]  ;;  %v228_v7 = vld [vmem:[#allocation7 + $0x70] sm:$0xff]  ;;  %v227_v8 = vld [vmem:[#allocation7 + $0x68] sm:$0xff]  ;;  %s596_s12 = sshll.u32 %s1044_s1, 4  ;;  %s597_s12 = int_to_ptr.vmem [resolvable:$true] %s596_s12 }
  0x4d   :  { %699 = vmatpush3.msra.mxu0 %v135_v1  ;;  %734 = vmatpush3.msra.mxu1 %v229_v5  ;;  %v130_v9 = vld [vmem:[#allocation5 + $0x50] sm:$0xff]  ;;  %v226_v10 = vld [vmem:[#allocation7 + $0x60] sm:$0xff]  ;;  %v129_v11 = vld [vmem:[#allocation5 + $0x48] sm:$0xff]  ;;  %s1004_s13 = scalar_lea.vmem %s597_s12, 128  ;;  %p1009_p3 = scmp.lt.s32.totalorder %s597_s12, %s597_s12 }
  0x4e   :  { %700 = vmatprep.subr.mxu0 %v1042_v0  ;;  %735 = vmatprep.subr.mxu1 %v1042_v0  ;;  %v225_v12 = vld [vmem:[#allocation7 + $0x58] sm:$0xff]  ;;  %v128_v13 = vld [vmem:[#allocation5 + $0x40] sm:$0xff]  ;;  %v224_v14 = vld [vmem:[#allocation7 + $0x50] sm:$0xff]  ;;  %p1005_p2 = scmp.ne.s32.totalorder %s597_s12, %s1004_s13  ;;  %p1010_p4 = scmp.lt.s32.totalorder %s1004_s13, %s1004_s13 }
  0x4f   :  { %701 = vmatpush3.msra.mxu0 %v134_v2  ;;  %736 = vmatpush3.msra.mxu1 %v228_v7  ;;  %v127_v15 = vld [vmem:[#allocation5 + $0x38] sm:$0xff]  ;;  %v223_v16 = vld [vmem:[#allocation7 + $0x48] sm:$0xff]  ;;  %v126_v17 = vld [vmem:[#allocation5 + $0x30] sm:$0xff] }
  0x50   :  { %702 = vmatprep.subr.mxu0 %v1042_v0  ;;  %737 = vmatprep.subr.mxu1 %v1042_v0  ;;  %v222_v18 = vld [vmem:[#allocation7 + $0x40] sm:$0xff]  ;;  %v125_v19 = vld [vmem:[#allocation5 + $0x28] sm:$0xff]  ;;  %v221_v20 = vld [vmem:[#allocation7 + $0x38] sm:$0xff]  ;;  %p1011_p5 = por %p1010_p4, %p1009_p3 }
  0x51   :  { %703 = vmatpush3.msra.mxu0 %v133_v3  ;;  %738 = vmatpush3.msra.mxu1 %v227_v8  ;;  %v124_v21 = vld [vmem:[#allocation5 + $0x20] sm:$0xff]  ;;  %v220_v22 = vld [vmem:[#allocation7 + $0x30] sm:$0xff]  ;;  %v123_v23 = vld [vmem:[#allocation5 + $0x18] sm:$0xff] }
  0x52   :  { %704 = vmatprep.subr.mxu0 %v1042_v0  ;;  %739 = vmatprep.subr.mxu1 %v1042_v0  ;;  %v219_v24 = vld [vmem:[#allocation7 + $0x28] sm:$0xff]  ;;  %v122_v25 = vld [vmem:[#allocation5 + $0x10] sm:$0xff]  ;;  %v218_v26 = vld [vmem:[#allocation7 + $0x20] sm:$0xff]  ;;  %p1012_p6 = pnand %p1011_p5, %p1005_p2 }
  0x53   :  { %705 = vmatpush3.msra.mxu0 %v132_v4  ;;  %740 = vmatpush3.msra.mxu1 %v226_v10  ;;  %v121_v27 = vld [vmem:[#allocation5 + $0x8] sm:$0xff]  ;;  %v217_v28 = vld [vmem:[#allocation7 + $0x18] sm:$0xff]  ;;  %v120_v29 = vld [vmem:[#allocation5] sm:$0xff] }
  0x54   :  { %706 = vmatprep.subr.mxu0 %v1042_v0  ;;  %741 = vmatprep.subr.mxu1 %v1042_v0  ;;  %v119_v30 = vld [vmem:[#allocation2] sm:$0xff]  ;;  %v216_v31 = vld [vmem:[#allocation7 + $0x10] sm:$0xff]  ;;  %v215_v32 = vld [vmem:[#allocation7 + $0x8] sm:$0xff] }
  0x55   :  { %707 = vmatpush3.msra.mxu0 %v131_v6  ;;  %742 = vmatpush3.msra.mxu1 %v225_v12  ;;  %v214_v33 = vld [vmem:[#allocation7] sm:$0xff]  ;;  %v323_v34 = vld [vmem:[#allocation8 + $0x78] sm:$0xff]  ;;  %v322_v35 = vld [vmem:[#allocation8 + $0x70] sm:$0xff] }
  0x56   :  { %708 = vmatprep.subr.mxu0 %v1042_v0  ;;  %743 = vmatprep.subr.mxu1 %v1042_v0  ;;  %v321_v36 = vld [vmem:[#allocation8 + $0x68] sm:$0xff]  ;;  %v320_v37 = vld [vmem:[#allocation8 + $0x60] sm:$0xff]  ;;  %v319_v38 = vld [vmem:[#allocation8 + $0x58] sm:$0xff] }
  0x57   :  { %709 = vmatpush3.msra.mxu0 %v130_v9  ;;  %744 = vmatpush3.msra.mxu1 %v224_v14  ;;  %v318_v39 = vld [vmem:[#allocation8 + $0x50] sm:$0xff]  ;;  %v317_v40 = vld [vmem:[#allocation8 + $0x48] sm:$0xff]  ;;  %v316_v41 = vld [vmem:[#allocation8 + $0x40] sm:$0xff] }
  0x58   :  { %710 = vmatprep.subr.mxu0 %v1042_v0  ;;  %745 = vmatprep.subr.mxu1 %v1042_v0  ;;  %v315_v42 = vld [vmem:[#allocation8 + $0x38] sm:$0xff]  ;;  %v314_v43 = vld [vmem:[#allocation8 + $0x30] sm:$0xff]  ;;  %v313_v44 = vld [vmem:[#allocation8 + $0x28] sm:$0xff] }
  0x59   :  { %711 = vmatpush3.msra.mxu0 %v129_v11  ;;  %746 = vmatpush3.msra.mxu1 %v223_v16  ;;  %v312_v45 = vld [vmem:[#allocation8 + $0x20] sm:$0xff]  ;;  %v311_v46 = vld [vmem:[#allocation8 + $0x18] sm:$0xff]  ;;  %v310_v52 = vld [vmem:[#allocation8 + $0x10] sm:$0xff] }
  0x5a   :  { %712 = vmatprep.subr.mxu0 %v1042_v0  ;;  %747 = vmatprep.subr.mxu1 %v1042_v0  ;;  %v608_v47 = vld [vmem:[%s1248_s2] ss:$0 sm:$0xff]  ;;  %v309_v53 = vld [vmem:[#allocation8 + $0x8] sm:$0xff]  ;;  %v308_v54 = vld [vmem:[#allocation8] sm:$0xff] }
  0x5b   :  { %713 = vmatpush3.msra.mxu0 %v128_v13  ;;  %748 = vmatpush3.msra.mxu1 %v222_v18  ;;  %v417_v55 = vld [vmem:[#allocation10 + $0x78] sm:$0xff]  ;;  %v416_v56 = vld [vmem:[#allocation10 + $0x70] sm:$0xff]  ;;  %v415_v57 = vld [vmem:[#allocation10 + $0x68] sm:$0xff] }
  0x5c   :  { %714 = vmatprep.subr.mxu0 %v1042_v0  ;;  %749 = vmatprep.subr.mxu1 %v1042_v0  ;;  %v414_v58 = vld [vmem:[#allocation10 + $0x60] sm:$0xff]  ;;  %v413_v59 = vld [vmem:[#allocation10 + $0x58] sm:$0xff]  ;;  %v412_v60 = vld [vmem:[#allocation10 + $0x50] sm:$0xff] }
  0x5d   :  { %715 = vmatpush3.msra.mxu0 %v127_v15  ;;  %750 = vmatpush3.msra.mxu1 %v221_v20  ;;  %v411_v61 = vld [vmem:[#allocation10 + $0x48] sm:$0xff]  ;;  %v410_v62 = vld [vmem:[#allocation10 + $0x40] sm:$0xff]  ;;  %v409_v63 = vld [vmem:[#allocation10 + $0x38] sm:$0xff] }
  0x5e   :  { %716 = vmatprep.subr.mxu0 %v1042_v0  ;;  %751 = vmatprep.subr.mxu1 %v1042_v0  ;;  %v408_v1 = vld [vmem:[#allocation10 + $0x30] sm:$0xff]  ;;  %v407_v2 = vld [vmem:[#allocation10 + $0x28] sm:$0xff]  ;;  %v406_v3 = vld [vmem:[#allocation10 + $0x20] sm:$0xff] }
  0x5f   :  { %717 = vmatpush3.msra.mxu0 %v126_v17  ;;  %752 = vmatpush3.msra.mxu1 %v220_v22  ;;  %v405_v4 = vld [vmem:[#allocation10 + $0x18] sm:$0xff]  ;;  %v404_v10 = vld [vmem:[#allocation10 + $0x10] sm:$0xff]  ;;  %v403_v11 = vld [vmem:[#allocation10 + $0x8] sm:$0xff] }
  0x60   :  { %718 = vmatprep.subr.mxu0 %v1042_v0  ;;  %753 = vmatprep.subr.mxu1 %v1042_v0  ;;  %v609_v5 = vld [vmem:[%s1250_s4] ss:$0 sm:$0xff]  ;;  %v402_v12 = vld [vmem:[#allocation10] sm:$0xff]  ;;  %v510_v14 = vld [vmem:[#allocation11 + $0x70] sm:$0xff] }
  0x61   :  { %719 = vmatpush3.msra.mxu0 %v125_v19  ;;  %754 = vmatpush3.msra.mxu1 %v219_v24  ;;  %v511_v13 = vld [vmem:[#allocation11 + $0x78] sm:$0xff]  ;;  %v509_v15 = vld [vmem:[#allocation11 + $0x68] sm:$0xff]  ;;  %v508_v16 = vld [vmem:[#allocation11 + $0x60] sm:$0xff] }
  0x62   :  { %720 = vmatprep.subr.mxu0 %v1042_v0  ;;  %755 = vmatprep.subr.mxu1 %v1042_v0  ;;  %v507_v17 = vld [vmem:[#allocation11 + $0x58] sm:$0xff]  ;;  %v506_v18 = vld [vmem:[#allocation11 + $0x50] sm:$0xff]  ;;  %v505_v19 = vld [vmem:[#allocation11 + $0x48] sm:$0xff] }
  0x63   :  { %721 = vmatpush3.msra.mxu0 %v124_v21  ;;  %756 = vmatpush3.msra.mxu1 %v218_v26  ;;  %v504_v20 = vld [vmem:[#allocation11 + $0x40] sm:$0xff]  ;;  %v503_v21 = vld [vmem:[#allocation11 + $0x38] sm:$0xff]  ;;  %v502_v22 = vld [vmem:[#allocation11 + $0x30] sm:$0xff] }
  0x64   :  { %722 = vmatprep.subr.mxu0 %v1042_v0  ;;  %757 = vmatprep.subr.mxu1 %v1042_v0  ;;  %v500_v24 = vld [vmem:[#allocation11 + $0x20] sm:$0xff]  ;;  %v610_v26 = vld [vmem:[%s1252_s6] ss:$0 sm:$0xff] }
  0x65   :  { %723 = vmatpush3.msra.mxu0 %v123_v23  ;;  %758 = vmatpush3.msra.mxu1 %v217_v28  ;;  %v501_v23 = vld [vmem:[#allocation11 + $0x28] sm:$0xff] }
  0x66   :  { %724 = vmatprep.subr.mxu0 %v1042_v0  ;;  %759 = vmatprep.subr.mxu1 %v1042_v0 }
  0x67   :  { %725 = vmatpush3.msra.mxu0 %v122_v25  ;;  %760 = vmatpush3.msra.mxu1 %v216_v31  ;;  %v499_v25 = vld [vmem:[#allocation11 + $0x18] sm:$0xff]  ;;  %v498_v31 = vld [vmem:[#allocation11 + $0x10] sm:$0xff] }
  0x68   :  { %726 = vmatprep.subr.mxu0 %v1042_v0  ;;  %761 = vmatprep.subr.mxu1 %v1042_v0 }
  0x69   :  { %727 = vmatpush3.msra.mxu0 %v121_v27  ;;  %762 = vmatpush3.msra.mxu1 %v215_v32  ;;  %v497_v32 = vld [vmem:[#allocation11 + $0x8] sm:$0xff] }
  0x6a   :  { %728 = vmatprep.subr.mxu0 %v1042_v0  ;;  %763 = vmatprep.subr.mxu1 %v1042_v0 }
  0x6b   :  { %729 = vmatpush3.msra.mxu0 %v120_v29  ;;  %764 = vmatpush3.msra.mxu1 %v214_v33  ;;  %v496_v33 = vld [vmem:[#allocation11] sm:$0xff] }
  0x6c   :  { %731 = vmatmul.mubr.f32.vlgmr.msra.gmra.mxu0 %v119_v30  ;;  %768 = vmatprep.subr.mxu0 %v1042_v0 }
  0x6d   :  { %800 = vmatprep.mubr.msk.f32.mxu0 %vm1043_vm0, %v1042_v0  ;;  %803 = vmatprep.subr.mxu1 %v1042_v0 }
  0x6e   :  { %769 = vmatpush3.msra.mxu0 %v323_v34  ;;  %v611_v34 = vld [vmem:[%s1254_s8] ss:$0 sm:$0xff] }
  0x6f   :  { %770 = vmatprep.subr.mxu0 %v1042_v0 }
  0x70   :  { %771 = vmatpush3.msra.mxu0 %v322_v35 }
  0x71   :  { %772 = vmatprep.subr.mxu0 %v1042_v0 }
  0x72   :  { %773 = vmatpush3.msra.mxu0 %v321_v36 }
  0x73   :  { %774 = vmatprep.subr.mxu0 %v1042_v0 }
  0x74   :  { %775 = vmatpush3.msra.mxu0 %v320_v37 }
  0x75   :  { %776 = vmatprep.subr.mxu0 %v1042_v0 }
  0x76   :  { %777 = vmatpush3.msra.mxu0 %v319_v38 }
  0x77   :  { %778 = vmatprep.subr.mxu0 %v1042_v0 }
  0x78   :  { %779 = vmatpush3.msra.mxu0 %v318_v39  ;;  %v612_v39 = vld [vmem:[%s1256_s10] ss:$0 sm:$0xff] }
  0x79   :  { %780 = vmatprep.subr.mxu0 %v1042_v0 }
  0x7a   :  { %781 = vmatpush3.msra.mxu0 %v317_v40 }
  0x7b   :  { %782 = vmatprep.subr.mxu0 %v1042_v0 }
  0x7c   :  { %783 = vmatpush3.msra.mxu0 %v316_v41 }
  0x7d   :  { %784 = vmatprep.subr.mxu0 %v1042_v0 }
  0x7e   :  { %785 = vmatpush3.msra.mxu0 %v315_v42 }
  0x7f   :  { %786 = vmatprep.subr.mxu0 %v1042_v0 }
  0x80   :  { %787 = vmatpush3.msra.mxu0 %v314_v43 }
  0x81   :  { %788 = vmatprep.subr.mxu0 %v1042_v0 }
  0x82   :  { %789 = vmatpush3.msra.mxu0 %v313_v44 }
  0x83   :  { %790 = vmatprep.subr.mxu0 %v1042_v0 }
  0x84   :  { %791 = vmatpush3.msra.mxu0 %v312_v45 }
  0x85   :  { %792 = vmatprep.subr.mxu0 %v1042_v0 }
  0x86   :  { %793 = vmatpush3.msra.mxu0 %v311_v46 }
  0x87   :  { %794 = vmatprep.subr.mxu0 %v1042_v0 }
  0x88   :  { %795 = vmatpush3.msra.mxu0 %v310_v52 }
  0x89   :  { %796 = vmatprep.subr.mxu0 %v1042_v0 }
  0x8a   :  { %797 = vmatpush3.msra.mxu0 %v309_v53 }
  0x8b   :  { %798 = vmatprep.subr.mxu0 %v1042_v0 }
  0x8c   :  { %799 = vmatpush3.msra.mxu0 %v308_v54 }
  0x8d   :  { %838 = vmatprep.subr.mxu0 %v1042_v0 }
 0x12c   :  { %v209_v48 = vpop.f32.mrf.mxu0 }
 0x12d   :  { %v210_v49 = vadd.f32 %v608_v47, %v209_v48 }
 0x12e   :  { %v732_v50 = vpop.f32.mrf.mxu0 }
 0x12f   :  { %v213_v51 = vmax.f32 %v210_v49, 0.0 }
 0x131   :  { %766 = vmatmul.mubr.f32.vlgmr.msra.gmra.mxu1 %v213_v51 }
 0x132   :  { %835 = vmatprep.mubr.msk.f32.mxu1 %vm1043_vm0, %v1042_v0  ;;  %804 = vmatpush3.msra.mxu1 %v417_v55 }
 0x133   :  { %805 = vmatprep.subr.mxu1 %v1042_v0 }
 0x134   :  { %806 = vmatpush3.msra.mxu1 %v416_v56 }
 0x135   :  { %807 = vmatprep.subr.mxu1 %v1042_v0 }
 0x136   :  { %808 = vmatpush3.msra.mxu1 %v415_v57 }
 0x137   :  { %809 = vmatprep.subr.mxu1 %v1042_v0 }
 0x138   :  { %810 = vmatpush3.msra.mxu1 %v414_v58 }
 0x139   :  { %811 = vmatprep.subr.mxu1 %v1042_v0 }
 0x13a   :  { %812 = vmatpush3.msra.mxu1 %v413_v59 }
 0x13b   :  { %813 = vmatprep.subr.mxu1 %v1042_v0 }
 0x13c   :  { %814 = vmatpush3.msra.mxu1 %v412_v60 }
 0x13d   :  { %815 = vmatprep.subr.mxu1 %v1042_v0 }
 0x13e   :  { %816 = vmatpush3.msra.mxu1 %v411_v61 }
 0x13f   :  { %817 = vmatprep.subr.mxu1 %v1042_v0 }
 0x140   :  { %818 = vmatpush3.msra.mxu1 %v410_v62 }
 0x141   :  { %819 = vmatprep.subr.mxu1 %v1042_v0 }
 0x142   :  { %820 = vmatpush3.msra.mxu1 %v409_v63 }
 0x143   :  { %821 = vmatprep.subr.mxu1 %v1042_v0 }
 0x144   :  { %822 = vmatpush3.msra.mxu1 %v408_v1 }
 0x145   :  { %823 = vmatprep.subr.mxu1 %v1042_v0 }
 0x146   :  { %824 = vmatpush3.msra.mxu1 %v407_v2 }
 0x147   :  { %825 = vmatprep.subr.mxu1 %v1042_v0 }
 0x148   :  { %826 = vmatpush3.msra.mxu1 %v406_v3 }
 0x149   :  { %827 = vmatprep.subr.mxu1 %v1042_v0 }
 0x14a   :  { %828 = vmatpush3.msra.mxu1 %v405_v4 }
 0x14b   :  { %829 = vmatprep.subr.mxu1 %v1042_v0 }
 0x14c   :  { %830 = vmatpush3.msra.mxu1 %v404_v10 }
 0x14d   :  { %831 = vmatprep.subr.mxu1 %v1042_v0 }
 0x14e   :  { %832 = vmatpush3.msra.mxu1 %v403_v11 }
 0x14f   :  { %833 = vmatprep.subr.mxu1 %v1042_v0 }
 0x150   :  { %834 = vmatpush3.msra.mxu1 %v402_v12 }
 0x1f1   :  { %v303_v6 = vpop.f32.mrf.mxu1 }
 0x1f2   :  { %v304_v7 = vadd.f32 %v609_v5, %v303_v6 }
 0x1f3   :  { %v767_v8 = vpop.f32.mrf.mxu1 }
 0x1f4   :  { %v307_v9 = vmax.f32 %v304_v7, 0.0 }
 0x1f6   :  { %801 = vmatmul.mubr.f32.vlgmr.msra.gmra.mxu0 %v307_v9 }
 0x1f7   :  { %870 = vmatprep.mubr.msk.f32.mxu0 %vm1043_vm0, %v1042_v0  ;;  %839 = vmatpush3.msra.mxu0 %v511_v13 }
 0x1f8   :  { %840 = vmatprep.subr.mxu0 %v1042_v0 }
 0x1f9   :  { %841 = vmatpush3.msra.mxu0 %v510_v14 }
 0x1fa   :  { %842 = vmatprep.subr.mxu0 %v1042_v0 }
 0x1fb   :  { %843 = vmatpush3.msra.mxu0 %v509_v15 }
 0x1fc   :  { %844 = vmatprep.subr.mxu0 %v1042_v0 }
 0x1fd   :  { %845 = vmatpush3.msra.mxu0 %v508_v16 }
 0x1fe   :  { %846 = vmatprep.subr.mxu0 %v1042_v0 }
 0x1ff   :  { %847 = vmatpush3.msra.mxu0 %v507_v17 }
 0x200   :  { %848 = vmatprep.subr.mxu0 %v1042_v0 }
 0x201   :  { %849 = vmatpush3.msra.mxu0 %v506_v18 }
 0x202   :  { %850 = vmatprep.subr.mxu0 %v1042_v0 }
 0x203   :  { %851 = vmatpush3.msra.mxu0 %v505_v19 }
 0x204   :  { %852 = vmatprep.subr.mxu0 %v1042_v0 }
 0x205   :  { %853 = vmatpush3.msra.mxu0 %v504_v20 }
 0x206   :  { %854 = vmatprep.subr.mxu0 %v1042_v0 }
 0x207   :  { %855 = vmatpush3.msra.mxu0 %v503_v21 }
 0x208   :  { %856 = vmatprep.subr.mxu0 %v1042_v0 }
 0x209   :  { %857 = vmatpush3.msra.mxu0 %v502_v22 }
 0x20a   :  { %858 = vmatprep.subr.mxu0 %v1042_v0 }
 0x20b   :  { %859 = vmatpush3.msra.mxu0 %v501_v23 }
 0x20c   :  { %860 = vmatprep.subr.mxu0 %v1042_v0 }
 0x20d   :  { %861 = vmatpush3.msra.mxu0 %v500_v24 }
 0x20e   :  { %862 = vmatprep.subr.mxu0 %v1042_v0 }
 0x20f   :  { %863 = vmatpush3.msra.mxu0 %v499_v25 }
 0x210   :  { %864 = vmatprep.subr.mxu0 %v1042_v0 }
 0x211   :  { %865 = vmatpush3.msra.mxu0 %v498_v31 }
 0x212   :  { %866 = vmatprep.subr.mxu0 %v1042_v0 }
 0x213   :  { %867 = vmatpush3.msra.mxu0 %v497_v32 }
 0x214   :  { %868 = vmatprep.subr.mxu0 %v1042_v0 }
 0x215   :  { %869 = vmatpush3.msra.mxu0 %v496_v33 }
 0x2b6   :  { %v397_v27 = vpop.f32.mrf.mxu0 }
 0x2b7   :  { %v398_v28 = vadd.f32 %v610_v26, %v397_v27 }
 0x2b8   :  { %v802_v29 = vpop.f32.mrf.mxu0 }
 0x2b9   :  { %v401_v30 = vmax.f32 %v398_v28, 0.0 }
 0x2bb   :  { %836 = vmatmul.mubr.f32.vlgmr.msra.gmra.mxu1 %v401_v30 }
 0x37b   :  { %v491_v35 = vpop.f32.mrf.mxu1 }
 0x37c   :  { %v492_v36 = vadd.f32 %v611_v34, %v491_v35 }
 0x37d   :  { %v837_v37 = vpop.f32.mrf.mxu1 }
 0x37e   :  { %v495_v38 = vmax.f32 %v492_v36, 0.0 }
 0x380   :  { %871 = vmatmul.mubr.f32.vlgmr.msra.gmra.mxu0 %v495_v38 }
 0x440   :  { %v585_v40 = vpop.f32.mrf.mxu0 }
 0x441   :  { %v586_v41 = vadd.f32 %v612_v39, %v585_v40 }
 0x442   :  { %v872_v0 = vpop.f32.mrf.mxu0 }
 0x443   :  { %589 = vst [vmem:[#allocation13] sm:$0xff] %v586_v41 }
 0x444   :  { %1015 = shalt.err (!%p1012_p6)
}
 0x445   :  { %599 = dma.vmem_to_hbm [thread:$0]  %s597_s12, 128, %s1257_s11, [#allocation4]  }
 0x446   :  { %1032 = dma.done.wait [#allocation4], 128  }
 0x447   :  { %1033 = vsyncadd [#allocation4], 4294967168 }
 0x448   :  { %603 = vsyncpa [#allocation3], 1 }
 0x449   :  { %604 = vsyncpa [#allocation6], 1 }
 0x44a   :  { %605 = vsyncpa [#allocation9], 1 }
 0x44b   :  { %606 = vsyncpa [#allocation12], 1 }
 0x44c   :  { %607 = vsyncpa [#allocation4], 1 }

</bundles_post_ra>
